<compile_context>
chip_gen: v6e
topology: v6e:2x2x1
jax: 0.10.0
libtpu: 0.0.40
codegen_flags: <defaults>
</compile_context>

<pallas_src>
import functools
import math

import jax
import jax.numpy as jnp
from jax.experimental import pallas as pl
from jax.experimental.pallas import tpu as pltpu


def _layernorm(x, gamma, beta, eps=1e-5):
    """LayerNorm with fp32 statistics, result cast back to x.dtype."""
    xf = x.astype(jnp.float32)
    mean = jnp.mean(xf, axis=-1, keepdims=True)
    var = jnp.mean((xf - mean) ** 2, axis=-1, keepdims=True)
    y = (xf - mean) * jax.lax.rsqrt(var + eps)
    y = y * gamma.astype(jnp.float32) + beta.astype(jnp.float32)
    return y.astype(x.dtype)


def resblock_kernel(xq_ref, xkv_ref,
                    ln1_g_ref, ln1_b_ref,
                    wq_ref, bq_ref, wk_ref, bk_ref, wv_ref, bv_ref,
                    wo_ref, bo_ref,
                    ln2_g_ref, ln2_b_ref,
                    wfc_ref, bfc_ref, wproj_ref, bproj_ref,
                    o_ref, *, n_head):
    """One ResidualAttentionBlock for a (tq, D) tile of query rows of one batch
    element; xkv_ref holds that batch element's full (L, D) sequence (keys/vals)."""
    xq = xq_ref[...]                       # (tq, D) residual-stream tile
    xkv = xkv_ref[...]                     # (L, D)  key/value source rows
    tq, D = xq.shape
    L = xkv.shape[0]
    Dh = D // n_head
    dt = xq.dtype

    # ---------------- attention branch: ln_1 -> MHA -> residual ----------------
    hq = _layernorm(xq, ln1_g_ref[...], ln1_b_ref[...])
    hkv = _layernorm(xkv, ln1_g_ref[...], ln1_b_ref[...])

    # Separate q/k/v projections (no lane-dim slicing of a packed (.,3D) buffer).
    # Operands stay in the input dtype; fp32 accumulation on the MXU.
    q = jnp.dot(hq, wq_ref[...], preferred_element_type=jnp.float32)
    q = q + bq_ref[...].astype(jnp.float32)
    k = jnp.dot(hkv, wk_ref[...], preferred_element_type=jnp.float32)
    k = k + bk_ref[...].astype(jnp.float32)
    v = jnp.dot(hkv, wv_ref[...], preferred_element_type=jnp.float32)
    v = v + bv_ref[...].astype(jnp.float32)

    # All heads in one batched contraction (head axis moved off the lane dim).
    scale = 1.0 / math.sqrt(Dh)
    qh = (q * scale).astype(dt).reshape(tq, n_head, Dh)
    kh = k.astype(dt).reshape(L, n_head, Dh)
    vh = v.astype(dt).reshape(L, n_head, Dh)

    s = jnp.einsum('qhd,khd->hqk', qh, kh,
                   preferred_element_type=jnp.float32)          # (H, tq, L) fp32
    m = jnp.max(s, axis=-1, keepdims=True)
    p = jnp.exp(s - m)
    denom = jnp.sum(p, axis=-1, keepdims=True)
    p = p * pl.reciprocal(denom, approx=True)                   # EUP, not VALU div
    attn = jnp.einsum('hqk,khd->qhd', p.astype(dt), vh,
                      preferred_element_type=jnp.float32)       # (tq, H, Dh)
    attn = attn.reshape(tq, D).astype(dt)

    attn = jnp.dot(attn, wo_ref[...], preferred_element_type=jnp.float32)
    attn = attn + bo_ref[...].astype(jnp.float32)
    x1 = xq + attn.astype(dt)

    # ---------------- MLP branch: ln_2 -> c_fc -> QuickGELU -> c_proj ----------
    h2 = _layernorm(x1, ln2_g_ref[...], ln2_b_ref[...])
    fc = jnp.dot(h2, wfc_ref[...], preferred_element_type=jnp.float32)
    fc = fc + bfc_ref[...].astype(jnp.float32)
    g = fc * jax.nn.sigmoid(1.702 * fc)                         # QuickGELU (fp32)
    proj = jnp.dot(g.astype(dt), wproj_ref[...], preferred_element_type=jnp.float32)
    proj = proj + bproj_ref[...].astype(jnp.float32)

    # Lane-dense (tq, D) store.
    o_ref[...] = x1 + proj.astype(dt)


def residual_attention_block(x_nld, p, n_head, *, q_tile=256,
                             vmem_limit_bytes=64 * 1024 * 1024):
    """x_nld: (N, L, D) batch-first. Returns (N, L, D)."""
    N, L, D = x_nld.shape
    tq = L if L <= q_tile else q_tile
    grid = (N, pl.cdiv(L, tq))

    def inv(shape):                      # grid-invariant (weight / bias) block
        return pl.BlockSpec(shape, lambda n, qi: (0,) * len(shape))

    q_spec = pl.BlockSpec((None, tq, D), lambda n, qi: (n, qi, 0))
    # Same block index for every qi -> the K/V rows of batch n are DMA'd once.
    kv_spec = pl.BlockSpec((None, L, D), lambda n, qi: (n, 0, 0))

    in_specs = [
        q_spec, kv_spec,
        inv((1, D)), inv((1, D)),                 # ln_1
        inv((D, D)), inv((1, D)),                 # W_q, b_q
        inv((D, D)), inv((1, D)),                 # W_k, b_k
        inv((D, D)), inv((1, D)),                 # W_v, b_v
        inv((D, D)), inv((1, D)),                 # out_proj
        inv((1, D)), inv((1, D)),                 # ln_2
        inv((D, 4 * D)), inv((1, 4 * D)),         # c_fc
        inv((4 * D, D)), inv((1, D)),             # c_proj
    ]
    out_spec = pl.BlockSpec((None, tq, D), lambda n, qi: (n, qi, 0))

    return pl.pallas_call(
        functools.partial(resblock_kernel, n_head=n_head),
        grid=grid,
        in_specs=in_specs,
        out_specs=out_spec,
        out_shape=jax.ShapeDtypeStruct(x_nld.shape, x_nld.dtype),
        compiler_params=pltpu.CompilerParams(
            # Both grid axes are independent -> shard across TensorCores on v7x
            # (2 TCs/chip); harmless on single-TC v5e/v6e.
            dimension_semantics=("parallel", "parallel"),
            # Raise the default scoped-VMEM limit (32 MiB). 64 MiB stays within
            # v7x's physical VMEM; can go to ~100 MiB on v5e/v6e for big widths.
            vmem_limit_bytes=vmem_limit_bytes,
        ),
    )(
        x_nld, x_nld,
        p['ln1_g'], p['ln1_b'],
        p['w_q'], p['b_q'], p['w_k'], p['b_k'], p['w_v'], p['b_v'],
        p['w_out'], p['b_out'],
        p['ln2_g'], p['ln2_b'],
        p['w_fc'], p['b_fc'], p['w_proj'], p['b_proj'],
    )


def transformer_forward(x_lnd, params, n_head):
    """x_lnd: (L, N, D) — PyTorch nn.MultiheadAttention (seq, batch, width) layout.
    One transpose pair at the stack boundary (not per layer)."""
    x = jnp.transpose(x_lnd, (1, 0, 2))            # (N, L, D)
    for layer_params in params:
        # TODO(synk): overlap layer i+1 weight DMA with layer i compute via
        # cross-call prefetch; per-layer pallas_call serializes weight loads.
        x = residual_attention_block(x, layer_params, n_head)
    return jnp.transpose(x, (1, 0, 2))             # back to (L, N, D)


def init_params(key, width, layers, dtype=jnp.float32):
    """Deterministic synthetic parameters (shapes mirror the PyTorch module).
    Weights stored (in_features, out_features) so the kernel computes x @ W + b
    (equivalent to PyTorch's x @ W.T); 1-D params carried as (1, width)."""
    params = []
    std = 0.02
    for _ in range(layers):
        key, *ks = jax.random.split(key, 13)

        def w(k, shape):
            return (std * jax.random.normal(k, shape)).astype(dtype)

        layer = {
            'ln1_g': jnp.ones((1, width), dtype),
            'ln1_b': jnp.zeros((1, width), dtype),
            'w_q': w(ks[0], (width, width)),        'b_q': w(ks[1], (1, width)),
            'w_k': w(ks[2], (width, width)),        'b_k': w(ks[3], (1, width)),
            'w_v': w(ks[4], (width, width)),        'b_v': w(ks[5], (1, width)),
            'w_out': w(ks[6], (width, width)),      'b_out': w(ks[7], (1, width)),
            'ln2_g': jnp.ones((1, width), dtype),
            'ln2_b': jnp.zeros((1, width), dtype),
            'w_fc': w(ks[8], (width, 4 * width)),   'b_fc': w(ks[9], (1, 4 * width)),
            'w_proj': w(ks[10], (4 * width, width)),'b_proj': w(ks[11], (1, width)),
        }
        params.append(layer)
    return params


def reference_forward(x_lnd, params, n_head):
    """Pure-jnp reference of the same forward math (validation only)."""
    def ln(x, g, b, eps=1e-5):
        xf = x.astype(jnp.float32)
        mu = jnp.mean(xf, axis=-1, keepdims=True)
        var = jnp.mean((xf - mu) ** 2, axis=-1, keepdims=True)
        y = (xf - mu) * jax.lax.rsqrt(var + eps)
        return (y * g.astype(jnp.float32) + b.astype(jnp.float32)).astype(x.dtype)

    x = jnp.transpose(x_lnd, (1, 0, 2))            # (N, L, D)
    N, L, D = x.shape
    H = n_head
    Dh = D // H
    for p in params:
        h = ln(x, p['ln1_g'], p['ln1_b'])
        q = (h @ p['w_q'] + p['b_q']) / math.sqrt(Dh)
        k = h @ p['w_k'] + p['b_k']
        v = h @ p['w_v'] + p['b_v']
        q = q.reshape(N, L, H, Dh)
        k = k.reshape(N, L, H, Dh)
        v = v.reshape(N, L, H, Dh)
        s = jnp.einsum('nqhd,nkhd->nhqk', q, k)
        a = jax.nn.softmax(s, axis=-1)
        o = jnp.einsum('nhqk,nkhd->nqhd', a, v).reshape(N, L, D)
        x = x + (o @ p['w_out'] + p['b_out'])
        h2 = ln(x, p['ln2_g'], p['ln2_b'])
        fc = h2 @ p['w_fc'] + p['b_fc']
        g = fc * jax.nn.sigmoid(1.702 * fc)
        x = x + (g @ p['w_proj'] + p['b_proj'])
    return jnp.transpose(x, (1, 0, 2))


if __name__ == "__main__":
    # Small shapes consistent with the module: width=32, heads=4, layers=2,
    # seq=8, batch=2. Input follows the PyTorch layout (L, N, D).
    L, N, D, H, LAYERS = 8, 2, 32, 4, 2

    key = jax.random.PRNGKey(0)
    kx, kp = jax.random.split(key)
    x = jax.random.normal(kx, (L, N, D), dtype=jnp.float32)
    params = init_params(kp, D, LAYERS)

    out = transformer_forward(x, params, n_head=H)
    out = jax.block_until_ready(out)
    assert out.shape == (L, N, D) and out.dtype == jnp.float32

    ref = jax.block_until_ready(reference_forward(x, params, n_head=H))
    err = float(jnp.max(jnp.abs(out - ref)))
    assert err < 2e-2, f"kernel/reference mismatch: max abs err = {err}"

    print("KERNEL_OK")
</pallas_src>

<mosaic_0001>
module attributes {stable_mosaic.version = 11 : i64} {
  func.func @resblock_kernel(%arg0: i32, %arg1: i32, %arg2: memref<1x8x32xf32, #tpu.memory_space<vmem>>, %arg3: memref<1x8x32xf32, #tpu.memory_space<vmem>>, %arg4: memref<1x32xf32, #tpu.memory_space<vmem>>, %arg5: memref<1x32xf32, #tpu.memory_space<vmem>>, %arg6: memref<32x32xf32, #tpu.memory_space<vmem>>, %arg7: memref<1x32xf32, #tpu.memory_space<vmem>>, %arg8: memref<32x32xf32, #tpu.memory_space<vmem>>, %arg9: memref<1x32xf32, #tpu.memory_space<vmem>>, %arg10: memref<32x32xf32, #tpu.memory_space<vmem>>, %arg11: memref<1x32xf32, #tpu.memory_space<vmem>>, %arg12: memref<32x32xf32, #tpu.memory_space<vmem>>, %arg13: memref<1x32xf32, #tpu.memory_space<vmem>>, %arg14: memref<1x32xf32, #tpu.memory_space<vmem>>, %arg15: memref<1x32xf32, #tpu.memory_space<vmem>>, %arg16: memref<32x128xf32, #tpu.memory_space<vmem>>, %arg17: memref<1x128xf32, #tpu.memory_space<vmem>>, %arg18: memref<128x32xf32, #tpu.memory_space<vmem>>, %arg19: memref<1x32xf32, #tpu.memory_space<vmem>>, %arg20: memref<1x8x32xf32, #tpu.memory_space<vmem>>) attributes {dimension_semantics = [#tpu.dimension_semantics<parallel>, #tpu.dimension_semantics<parallel>], iteration_bounds = array<i64: 2, 1>, scalar_prefetch = 0 : i64, scratch_operands = 0 : i64, tpu.core_type = #tpu.core_type<tc>, window_params = [{transform_indices = @transform_0, window_bounds = array<i64: 1, 8, 32>}, {transform_indices = @transform_1, window_bounds = array<i64: 1, 8, 32>}, {pipeline_mode = #tpu.pipeline_mode<synchronous>, transform_indices = @transform_2, window_bounds = array<i64: 1, 32>}, {pipeline_mode = #tpu.pipeline_mode<synchronous>, transform_indices = @transform_3, window_bounds = array<i64: 1, 32>}, {pipeline_mode = #tpu.pipeline_mode<synchronous>, transform_indices = @transform_4, window_bounds = array<i64: 32, 32>}, {pipeline_mode = #tpu.pipeline_mode<synchronous>, transform_indices = @transform_5, window_bounds = array<i64: 1, 32>}, {pipeline_mode = #tpu.pipeline_mode<synchronous>, transform_indices = @transform_6, window_bounds = array<i64: 32, 32>}, {pipeline_mode = #tpu.pipeline_mode<synchronous>, transform_indices = @transform_7, window_bounds = array<i64: 1, 32>}, {pipeline_mode = #tpu.pipeline_mode<synchronous>, transform_indices = @transform_8, window_bounds = array<i64: 32, 32>}, {pipeline_mode = #tpu.pipeline_mode<synchronous>, transform_indices = @transform_9, window_bounds = array<i64: 1, 32>}, {pipeline_mode = #tpu.pipeline_mode<synchronous>, transform_indices = @transform_10, window_bounds = array<i64: 32, 32>}, {pipeline_mode = #tpu.pipeline_mode<synchronous>, transform_indices = @transform_11, window_bounds = array<i64: 1, 32>}, {pipeline_mode = #tpu.pipeline_mode<synchronous>, transform_indices = @transform_12, window_bounds = array<i64: 1, 32>}, {pipeline_mode = #tpu.pipeline_mode<synchronous>, transform_indices = @transform_13, window_bounds = array<i64: 1, 32>}, {pipeline_mode = #tpu.pipeline_mode<synchronous>, transform_indices = @transform_14, window_bounds = array<i64: 32, 128>}, {pipeline_mode = #tpu.pipeline_mode<synchronous>, transform_indices = @transform_15, window_bounds = array<i64: 1, 128>}, {pipeline_mode = #tpu.pipeline_mode<synchronous>, transform_indices = @transform_16, window_bounds = array<i64: 128, 32>}, {pipeline_mode = #tpu.pipeline_mode<synchronous>, transform_indices = @transform_17, window_bounds = array<i64: 1, 32>}, {transform_indices = @transform_18, window_bounds = array<i64: 1, 8, 32>}]} {
    %c0 = arith.constant 0 : index
    %c0_0 = arith.constant 0 : index
    %c0_1 = arith.constant 0 : index
    %0 = vector.load %arg2[%c0, %c0_0, %c0_1] : memref<1x8x32xf32, #tpu.memory_space<vmem>>, vector<1x8x32xf32>
    %1 = vector.shape_cast %0 : vector<1x8x32xf32> to vector<8x32xf32>
    %c0_2 = arith.constant 0 : index
    %c0_3 = arith.constant 0 : index
    %c0_4 = arith.constant 0 : index
    %2 = vector.load %arg3[%c0_2, %c0_3, %c0_4] : memref<1x8x32xf32, #tpu.memory_space<vmem>>, vector<1x8x32xf32>
    %3 = vector.shape_cast %2 : vector<1x8x32xf32> to vector<8x32xf32>
    %c0_5 = arith.constant 0 : index
    %c0_6 = arith.constant 0 : index
    %4 = vector.load %arg4[%c0_5, %c0_6] : memref<1x32xf32, #tpu.memory_space<vmem>>, vector<1x32xf32>
    %c0_7 = arith.constant 0 : index
    %c0_8 = arith.constant 0 : index
    %5 = vector.load %arg5[%c0_7, %c0_8] : memref<1x32xf32, #tpu.memory_space<vmem>>, vector<1x32xf32>
    %cst = arith.constant dense<0.000000e+00> : vector<8xf32>
    %6 = vector.multi_reduction <add>, %1, %cst [1] : vector<8x32xf32> to vector<8xf32>
    %7 = vector.shape_cast %6 : vector<8xf32> to vector<8x1xf32>
    %cst_9 = arith.constant 3.200000e+01 : f32
    %8 = vector.broadcast %cst_9 : f32 to vector<8x1xf32>
    %9 = arith.divf %7, %8 : vector<8x1xf32>
    %10 = vector.broadcast %9 : vector<8x1xf32> to vector<8x32xf32>
    %11 = arith.subf %1, %10 : vector<8x32xf32>
    %12 = arith.mulf %11, %11 : vector<8x32xf32>
    %cst_10 = arith.constant dense<0.000000e+00> : vector<8xf32>
    %13 = vector.multi_reduction <add>, %12, %cst_10 [1] : vector<8x32xf32> to vector<8xf32>
    %14 = vector.shape_cast %13 : vector<8xf32> to vector<8x1xf32>
    %cst_11 = arith.constant 3.200000e+01 : f32
    %15 = vector.broadcast %cst_11 : f32 to vector<8x1xf32>
    %16 = arith.divf %14, %15 : vector<8x1xf32>
    %17 = vector.broadcast %9 : vector<8x1xf32> to vector<8x32xf32>
    %18 = arith.subf %1, %17 : vector<8x32xf32>
    %cst_12 = arith.constant 9.99999974E-6 : f32
    %19 = vector.broadcast %cst_12 : f32 to vector<8x1xf32>
    %20 = arith.addf %16, %19 : vector<8x1xf32>
    %21 = math.rsqrt %20 : vector<8x1xf32>
    %22 = vector.broadcast %21 : vector<8x1xf32> to vector<8x32xf32>
    %23 = arith.mulf %18, %22 : vector<8x32xf32>
    %24 = vector.broadcast %4 : vector<1x32xf32> to vector<8x32xf32>
    %25 = arith.mulf %23, %24 : vector<8x32xf32>
    %26 = vector.broadcast %5 : vector<1x32xf32> to vector<8x32xf32>
    %27 = arith.addf %25, %26 : vector<8x32xf32>
    %c0_13 = arith.constant 0 : index
    %c0_14 = arith.constant 0 : index
    %28 = vector.load %arg4[%c0_13, %c0_14] : memref<1x32xf32, #tpu.memory_space<vmem>>, vector<1x32xf32>
    %c0_15 = arith.constant 0 : index
    %c0_16 = arith.constant 0 : index
    %29 = vector.load %arg5[%c0_15, %c0_16] : memref<1x32xf32, #tpu.memory_space<vmem>>, vector<1x32xf32>
    %cst_17 = arith.constant dense<0.000000e+00> : vector<8xf32>
    %30 = vector.multi_reduction <add>, %3, %cst_17 [1] : vector<8x32xf32> to vector<8xf32>
    %31 = vector.shape_cast %30 : vector<8xf32> to vector<8x1xf32>
    %cst_18 = arith.constant 3.200000e+01 : f32
    %32 = vector.broadcast %cst_18 : f32 to vector<8x1xf32>
    %33 = arith.divf %31, %32 : vector<8x1xf32>
    %34 = vector.broadcast %33 : vector<8x1xf32> to vector<8x32xf32>
    %35 = arith.subf %3, %34 : vector<8x32xf32>
    %36 = arith.mulf %35, %35 : vector<8x32xf32>
    %cst_19 = arith.constant dense<0.000000e+00> : vector<8xf32>
    %37 = vector.multi_reduction <add>, %36, %cst_19 [1] : vector<8x32xf32> to vector<8xf32>
    %38 = vector.shape_cast %37 : vector<8xf32> to vector<8x1xf32>
    %cst_20 = arith.constant 3.200000e+01 : f32
    %39 = vector.broadcast %cst_20 : f32 to vector<8x1xf32>
    %40 = arith.divf %38, %39 : vector<8x1xf32>
    %41 = vector.broadcast %33 : vector<8x1xf32> to vector<8x32xf32>
    %42 = arith.subf %3, %41 : vector<8x32xf32>
    %cst_21 = arith.constant 9.99999974E-6 : f32
    %43 = vector.broadcast %cst_21 : f32 to vector<8x1xf32>
    %44 = arith.addf %40, %43 : vector<8x1xf32>
    %45 = math.rsqrt %44 : vector<8x1xf32>
    %46 = vector.broadcast %45 : vector<8x1xf32> to vector<8x32xf32>
    %47 = arith.mulf %42, %46 : vector<8x32xf32>
    %48 = vector.broadcast %28 : vector<1x32xf32> to vector<8x32xf32>
    %49 = arith.mulf %47, %48 : vector<8x32xf32>
    %50 = vector.broadcast %29 : vector<1x32xf32> to vector<8x32xf32>
    %51 = arith.addf %49, %50 : vector<8x32xf32>
    %c0_22 = arith.constant 0 : index
    %c0_23 = arith.constant 0 : index
    %52 = vector.load %arg6[%c0_22, %c0_23] : memref<32x32xf32, #tpu.memory_space<vmem>>, vector<32x32xf32>
    %cst_24 = arith.constant dense<0.000000e+00> : vector<8x32xf32>
    %53 = tpu.matmul %27, %52, %cst_24 {dimension_numbers = #tpu.dot_dimension_numbers<[1], [0], [0], [1], [0, 0, 1, 1], [], []>} : vector<8x32xf32>, vector<32x32xf32>, vector<8x32xf32> -> vector<8x32xf32>
    %c0_25 = arith.constant 0 : index
    %c0_26 = arith.constant 0 : index
    %54 = vector.load %arg7[%c0_25, %c0_26] : memref<1x32xf32, #tpu.memory_space<vmem>>, vector<1x32xf32>
    %55 = vector.broadcast %54 : vector<1x32xf32> to vector<8x32xf32>
    %56 = arith.addf %53, %55 : vector<8x32xf32>
    %c0_27 = arith.constant 0 : index
    %c0_28 = arith.constant 0 : index
    %57 = vector.load %arg8[%c0_27, %c0_28] : memref<32x32xf32, #tpu.memory_space<vmem>>, vector<32x32xf32>
    %cst_29 = arith.constant dense<0.000000e+00> : vector<8x32xf32>
    %58 = tpu.matmul %51, %57, %cst_29 {dimension_numbers = #tpu.dot_dimension_numbers<[1], [0], [0], [1], [0, 0, 1, 1], [], []>} : vector<8x32xf32>, vector<32x32xf32>, vector<8x32xf32> -> vector<8x32xf32>
    %c0_30 = arith.constant 0 : index
    %c0_31 = arith.constant 0 : index
    %59 = vector.load %arg9[%c0_30, %c0_31] : memref<1x32xf32, #tpu.memory_space<vmem>>, vector<1x32xf32>
    %60 = vector.broadcast %59 : vector<1x32xf32> to vector<8x32xf32>
    %61 = arith.addf %58, %60 : vector<8x32xf32>
    %c0_32 = arith.constant 0 : index
    %c0_33 = arith.constant 0 : index
    %62 = vector.load %arg10[%c0_32, %c0_33] : memref<32x32xf32, #tpu.memory_space<vmem>>, vector<32x32xf32>
    %cst_34 = arith.constant dense<0.000000e+00> : vector<8x32xf32>
    %63 = tpu.matmul %51, %62, %cst_34 {dimension_numbers = #tpu.dot_dimension_numbers<[1], [0], [0], [1], [0, 0, 1, 1], [], []>} : vector<8x32xf32>, vector<32x32xf32>, vector<8x32xf32> -> vector<8x32xf32>
    %c0_35 = arith.constant 0 : index
    %c0_36 = arith.constant 0 : index
    %64 = vector.load %arg11[%c0_35, %c0_36] : memref<1x32xf32, #tpu.memory_space<vmem>>, vector<1x32xf32>
    %65 = vector.broadcast %64 : vector<1x32xf32> to vector<8x32xf32>
    %66 = arith.addf %63, %65 : vector<8x32xf32>
    %cst_37 = arith.constant 0.353553385 : f32
    %67 = vector.broadcast %cst_37 : f32 to vector<8x32xf32>
    %68 = arith.mulf %56, %67 : vector<8x32xf32>
    %69 = vector.shape_cast %68 : vector<8x32xf32> to vector<8x4x8xf32>
    %70 = vector.shape_cast %61 : vector<8x32xf32> to vector<8x4x8xf32>
    %71 = vector.shape_cast %66 : vector<8x32xf32> to vector<8x4x8xf32>
    "tpu.trace_start"() <{level = 10 : i32, message = "qhd,khd->hqk"}> : () -> ()
    %cst_38 = arith.constant dense<0.000000e+00> : vector<4x8x8xf32>
    %72 = tpu.matmul %69, %70, %cst_38 {dimension_numbers = #tpu.dot_dimension_numbers<[2], [2], [0], [0], [0, 1, 0, 0, 1, 0], [1], [1]>} : vector<8x4x8xf32>, vector<8x4x8xf32>, vector<4x8x8xf32> -> vector<4x8x8xf32>
    "tpu.trace_stop"() : () -> ()
    %cst_39 = arith.constant dense<0xFF800000> : vector<4x8xf32>
    %73 = vector.multi_reduction <maximumf>, %72, %cst_39 [2] : vector<4x8x8xf32> to vector<4x8xf32>
    %74 = vector.shape_cast %73 : vector<4x8xf32> to vector<4x8x1xf32>
    %75 = vector.broadcast %74 : vector<4x8x1xf32> to vector<4x8x8xf32>
    %76 = arith.subf %72, %75 : vector<4x8x8xf32>
    %77 = math.exp %76 : vector<4x8x8xf32>
    %cst_40 = arith.constant dense<0.000000e+00> : vector<4x8xf32>
    %78 = vector.multi_reduction <add>, %77, %cst_40 [2] : vector<4x8x8xf32> to vector<4x8xf32>
    %79 = vector.shape_cast %78 : vector<4x8xf32> to vector<4x8x1xf32>
    %80 = tpu.reciprocal %79 {approx = true} : vector<4x8x1xf32> -> vector<4x8x1xf32>
    %81 = vector.broadcast %80 : vector<4x8x1xf32> to vector<4x8x8xf32>
    %82 = arith.mulf %77, %81 : vector<4x8x8xf32>
    "tpu.trace_start"() <{level = 10 : i32, message = "hqk,khd->qhd"}> : () -> ()
    %cst_41 = arith.constant dense<0.000000e+00> : vector<4x8x8xf32>
    %83 = tpu.matmul %71, %82, %cst_41 {dimension_numbers = #tpu.dot_dimension_numbers<[0], [2], [2], [1], [0, 1, 0, 2, 1, 1], [1], [0]>} : vector<8x4x8xf32>, vector<4x8x8xf32>, vector<4x8x8xf32> -> vector<4x8x8xf32>
    %84 = tpu.transpose %83, [2, 0, 1] : vector<4x8x8xf32> -> vector<8x4x8xf32>
    "tpu.trace_stop"() : () -> ()
    %85 = vector.shape_cast %84 : vector<8x4x8xf32> to vector<8x32xf32>
    %c0_42 = arith.constant 0 : index
    %c0_43 = arith.constant 0 : index
    %86 = vector.load %arg12[%c0_42, %c0_43] : memref<32x32xf32, #tpu.memory_space<vmem>>, vector<32x32xf32>
    %cst_44 = arith.constant dense<0.000000e+00> : vector<8x32xf32>
    %87 = tpu.matmul %85, %86, %cst_44 {dimension_numbers = #tpu.dot_dimension_numbers<[1], [0], [0], [1], [0, 0, 1, 1], [], []>} : vector<8x32xf32>, vector<32x32xf32>, vector<8x32xf32> -> vector<8x32xf32>
    %c0_45 = arith.constant 0 : index
    %c0_46 = arith.constant 0 : index
    %88 = vector.load %arg13[%c0_45, %c0_46] : memref<1x32xf32, #tpu.memory_space<vmem>>, vector<1x32xf32>
    %89 = vector.broadcast %88 : vector<1x32xf32> to vector<8x32xf32>
    %90 = arith.addf %87, %89 : vector<8x32xf32>
    %91 = arith.addf %1, %90 : vector<8x32xf32>
    %c0_47 = arith.constant 0 : index
    %c0_48 = arith.constant 0 : index
    %92 = vector.load %arg14[%c0_47, %c0_48] : memref<1x32xf32, #tpu.memory_space<vmem>>, vector<1x32xf32>
    %c0_49 = arith.constant 0 : index
    %c0_50 = arith.constant 0 : index
    %93 = vector.load %arg15[%c0_49, %c0_50] : memref<1x32xf32, #tpu.memory_space<vmem>>, vector<1x32xf32>
    %cst_51 = arith.constant dense<0.000000e+00> : vector<8xf32>
    %94 = vector.multi_reduction <add>, %91, %cst_51 [1] : vector<8x32xf32> to vector<8xf32>
    %95 = vector.shape_cast %94 : vector<8xf32> to vector<8x1xf32>
    %cst_52 = arith.constant 3.200000e+01 : f32
    %96 = vector.broadcast %cst_52 : f32 to vector<8x1xf32>
    %97 = arith.divf %95, %96 : vector<8x1xf32>
    %98 = vector.broadcast %97 : vector<8x1xf32> to vector<8x32xf32>
    %99 = arith.subf %91, %98 : vector<8x32xf32>
    %100 = arith.mulf %99, %99 : vector<8x32xf32>
    %cst_53 = arith.constant dense<0.000000e+00> : vector<8xf32>
    %101 = vector.multi_reduction <add>, %100, %cst_53 [1] : vector<8x32xf32> to vector<8xf32>
    %102 = vector.shape_cast %101 : vector<8xf32> to vector<8x1xf32>
    %cst_54 = arith.constant 3.200000e+01 : f32
    %103 = vector.broadcast %cst_54 : f32 to vector<8x1xf32>
    %104 = arith.divf %102, %103 : vector<8x1xf32>
    %105 = vector.broadcast %97 : vector<8x1xf32> to vector<8x32xf32>
    %106 = arith.subf %91, %105 : vector<8x32xf32>
    %cst_55 = arith.constant 9.99999974E-6 : f32
    %107 = vector.broadcast %cst_55 : f32 to vector<8x1xf32>
    %108 = arith.addf %104, %107 : vector<8x1xf32>
    %109 = math.rsqrt %108 : vector<8x1xf32>
    %110 = vector.broadcast %109 : vector<8x1xf32> to vector<8x32xf32>
    %111 = arith.mulf %106, %110 : vector<8x32xf32>
    %112 = vector.broadcast %92 : vector<1x32xf32> to vector<8x32xf32>
    %113 = arith.mulf %111, %112 : vector<8x32xf32>
    %114 = vector.broadcast %93 : vector<1x32xf32> to vector<8x32xf32>
    %115 = arith.addf %113, %114 : vector<8x32xf32>
    %c0_56 = arith.constant 0 : index
    %c0_57 = arith.constant 0 : index
    %116 = vector.load %arg16[%c0_56, %c0_57] : memref<32x128xf32, #tpu.memory_space<vmem>>, vector<32x128xf32>
    %cst_58 = arith.constant dense<0.000000e+00> : vector<8x128xf32>
    %117 = tpu.matmul %115, %116, %cst_58 {dimension_numbers = #tpu.dot_dimension_numbers<[1], [0], [0], [1], [0, 0, 1, 1], [], []>} : vector<8x32xf32>, vector<32x128xf32>, vector<8x128xf32> -> vector<8x128xf32>
    %c0_59 = arith.constant 0 : index
    %c0_60 = arith.constant 0 : index
    %118 = vector.load %arg17[%c0_59, %c0_60] : memref<1x128xf32, #tpu.memory_space<vmem>>, vector<1x128xf32>
    %119 = vector.broadcast %118 : vector<1x128xf32> to vector<8x128xf32>
    %120 = arith.addf %117, %119 : vector<8x128xf32>
    %cst_61 = arith.constant 1.702000e+00 : f32
    %121 = vector.broadcast %cst_61 : f32 to vector<8x128xf32>
    %122 = arith.mulf %121, %120 : vector<8x128xf32>
    %123 = arith.negf %122 : vector<8x128xf32>
    %124 = math.exp %123 : vector<8x128xf32>
    %cst_62 = arith.constant 1.000000e+00 : f32
    %125 = vector.broadcast %cst_62 : f32 to vector<8x128xf32>
    %126 = arith.addf %125, %124 : vector<8x128xf32>
    %127 = arith.divf %125, %126 : vector<8x128xf32>
    %128 = arith.mulf %120, %127 : vector<8x128xf32>
    %c0_63 = arith.constant 0 : index
    %c0_64 = arith.constant 0 : index
    %129 = vector.load %arg18[%c0_63, %c0_64] : memref<128x32xf32, #tpu.memory_space<vmem>>, vector<128x32xf32>
    %cst_65 = arith.constant dense<0.000000e+00> : vector<8x32xf32>
    %130 = tpu.matmul %128, %129, %cst_65 {dimension_numbers = #tpu.dot_dimension_numbers<[1], [0], [0], [1], [0, 0, 1, 1], [], []>} : vector<8x128xf32>, vector<128x32xf32>, vector<8x32xf32> -> vector<8x32xf32>
    %c0_66 = arith.constant 0 : index
    %c0_67 = arith.constant 0 : index
    %131 = vector.load %arg19[%c0_66, %c0_67] : memref<1x32xf32, #tpu.memory_space<vmem>>, vector<1x32xf32>
    %132 = vector.broadcast %131 : vector<1x32xf32> to vector<8x32xf32>
    %133 = arith.addf %130, %132 : vector<8x32xf32>
    %134 = arith.addf %91, %133 : vector<8x32xf32>
    %c0_68 = arith.constant 0 : index
    %c0_69 = arith.constant 0 : index
    %c0_70 = arith.constant 0 : index
    %135 = vector.load %arg20[%c0_68, %c0_69, %c0_70] : memref<1x8x32xf32, #tpu.memory_space<vmem>>, vector<1x8x32xf32>
    %136 = vector.shape_cast %135 : vector<1x8x32xf32> to vector<8x32xf32>
    %137 = vector.shape_cast %134 : vector<8x32xf32> to vector<1x8x32xf32>
    tpu.vector_store %arg20[%c0_68, %c0_69, %c0_70], %137 {strides = array<i32>} : memref<1x8x32xf32, #tpu.memory_space<vmem>>, vector<1x8x32xf32>,
    return
  }
  func.func @transform_0(%arg0: i32, %arg1: i32) -> (i32, i32, i32) {
    %c0_i32 = arith.constant 0 : i32
    %c0_i32_0 = arith.constant 0 : i32
    return %arg0, %arg1, %c0_i32 : i32, i32, i32
  }
  func.func @transform_1(%arg0: i32, %arg1: i32) -> (i32, i32, i32) {
    %c0_i32 = arith.constant 0 : i32
    %c0_i32_0 = arith.constant 0 : i32
    %c0_i32_1 = arith.constant 0 : i32
    return %arg0, %c0_i32, %c0_i32_0 : i32, i32, i32
  }
  func.func @transform_2(%arg0: i32, %arg1: i32) -> (i32, i32) {
    %c0_i32 = arith.constant 0 : i32
    %c0_i32_0 = arith.constant 0 : i32
    %c0_i32_1 = arith.constant 0 : i32
    return %c0_i32, %c0_i32_0 : i32, i32
  }
  func.func @transform_3(%arg0: i32, %arg1: i32) -> (i32, i32) {
    %c0_i32 = arith.constant 0 : i32
    %c0_i32_0 = arith.constant 0 : i32
    %c0_i32_1 = arith.constant 0 : i32
    return %c0_i32, %c0_i32_0 : i32, i32
  }
  func.func @transform_4(%arg0: i32, %arg1: i32) -> (i32, i32) {
    %c0_i32 = arith.constant 0 : i32
    %c0_i32_0 = arith.constant 0 : i32
    %c0_i32_1 = arith.constant 0 : i32
    return %c0_i32, %c0_i32_0 : i32, i32
  }
  func.func @transform_5(%arg0: i32, %arg1: i32) -> (i32, i32) {
    %c0_i32 = arith.constant 0 : i32
    %c0_i32_0 = arith.constant 0 : i32
    %c0_i32_1 = arith.constant 0 : i32
    return %c0_i32, %c0_i32_0 : i32, i32
  }
  func.func @transform_6(%arg0: i32, %arg1: i32) -> (i32, i32) {
    %c0_i32 = arith.constant 0 : i32
    %c0_i32_0 = arith.constant 0 : i32
    %c0_i32_1 = arith.constant 0 : i32
    return %c0_i32, %c0_i32_0 : i32, i32
  }
  func.func @transform_7(%arg0: i32, %arg1: i32) -> (i32, i32) {
    %c0_i32 = arith.constant 0 : i32
    %c0_i32_0 = arith.constant 0 : i32
    %c0_i32_1 = arith.constant 0 : i32
    return %c0_i32, %c0_i32_0 : i32, i32
  }
  func.func @transform_8(%arg0: i32, %arg1: i32) -> (i32, i32) {
    %c0_i32 = arith.constant 0 : i32
    %c0_i32_0 = arith.constant 0 : i32
    %c0_i32_1 = arith.constant 0 : i32
    return %c0_i32, %c0_i32_0 : i32, i32
  }
  func.func @transform_9(%arg0: i32, %arg1: i32) -> (i32, i32) {
    %c0_i32 = arith.constant 0 : i32
    %c0_i32_0 = arith.constant 0 : i32
    %c0_i32_1 = arith.constant 0 : i32
    return %c0_i32, %c0_i32_0 : i32, i32
  }
  func.func @transform_10(%arg0: i32, %arg1: i32) -> (i32, i32) {
    %c0_i32 = arith.constant 0 : i32
    %c0_i32_0 = arith.constant 0 : i32
    %c0_i32_1 = arith.constant 0 : i32
    return %c0_i32, %c0_i32_0 : i32, i32
  }
  func.func @transform_11(%arg0: i32, %arg1: i32) -> (i32, i32) {
    %c0_i32 = arith.constant 0 : i32
    %c0_i32_0 = arith.constant 0 : i32
    %c0_i32_1 = arith.constant 0 : i32
    return %c0_i32, %c0_i32_0 : i32, i32
  }
  func.func @transform_12(%arg0: i32, %arg1: i32) -> (i32, i32) {
    %c0_i32 = arith.constant 0 : i32
    %c0_i32_0 = arith.constant 0 : i32
    %c0_i32_1 = arith.constant 0 : i32
    return %c0_i32, %c0_i32_0 : i32, i32
  }
  func.func @transform_13(%arg0: i32, %arg1: i32) -> (i32, i32) {
    %c0_i32 = arith.constant 0 : i32
    %c0_i32_0 = arith.constant 0 : i32
    %c0_i32_1 = arith.constant 0 : i32
    return %c0_i32, %c0_i32_0 : i32, i32
  }
  func.func @transform_14(%arg0: i32, %arg1: i32) -> (i32, i32) {
    %c0_i32 = arith.constant 0 : i32
    %c0_i32_0 = arith.constant 0 : i32
    %c0_i32_1 = arith.constant 0 : i32
    return %c0_i32, %c0_i32_0 : i32, i32
  }
  func.func @transform_15(%arg0: i32, %arg1: i32) -> (i32, i32) {
    %c0_i32 = arith.constant 0 : i32
    %c0_i32_0 = arith.constant 0 : i32
    %c0_i32_1 = arith.constant 0 : i32
    return %c0_i32, %c0_i32_0 : i32, i32
  }
  func.func @transform_16(%arg0: i32, %arg1: i32) -> (i32, i32) {
    %c0_i32 = arith.constant 0 : i32
    %c0_i32_0 = arith.constant 0 : i32
    %c0_i32_1 = arith.constant 0 : i32
    return %c0_i32, %c0_i32_0 : i32, i32
  }
  func.func @transform_17(%arg0: i32, %arg1: i32) -> (i32, i32) {
    %c0_i32 = arith.constant 0 : i32
    %c0_i32_0 = arith.constant 0 : i32
    %c0_i32_1 = arith.constant 0 : i32
    return %c0_i32, %c0_i32_0 : i32, i32
  }
  func.func @transform_18(%arg0: i32, %arg1: i32) -> (i32, i32, i32) {
    %c0_i32 = arith.constant 0 : i32
    %c0_i32_0 = arith.constant 0 : i32
    return %arg0, %arg1, %c0_i32 : i32, i32, i32
  }
}

</mosaic_0001>

<bundles_post_ra>
// kernel: tpu_custom_call.1
= control target key start
LH: loop header
LB: loop body
LE: loop exit
PB: predicated region body
PF: predicated region fallthrough
CT: control target
= control target key end

     0   :  { %s3578_s0 = inlined_call_operand.hbm [shape: f32[2,8,32], index: 0, kind: input, shape index: {}]   ;;  %s3579_s1 = inlined_call_operand.hbm [shape: f32[2,8,32], index: 1, kind: input, shape index: {}]   ;;  %s3580_s2 = inlined_call_operand.vmem [shape: f32[1,32], index: 2, kind: input, shape index: {}]   ;;  %s3581_s3 = inlined_call_operand.vmem [shape: f32[1,32], index: 3, kind: input, shape index: {}]   ;;  %s3582_s4 = inlined_call_operand.vmem [shape: f32[32,32], index: 4, kind: input, shape index: {}]   ;;  %s3583_s5 = inlined_call_operand.vmem [shape: f32[1,32], index: 5, kind: input, shape index: {}]   ;;  %s3584_s6 = inlined_call_operand.vmem [shape: f32[32,32], index: 6, kind: input, shape index: {}]   ;;  %s3585_s7 = inlined_call_operand.vmem [shape: f32[1,32], index: 7, kind: input, shape index: {}]   ;;  %s3586_s8 = inlined_call_operand.vmem [shape: f32[32,32], index: 8, kind: input, shape index: {}]   ;;  %s3587_s9 = inlined_call_operand.vmem [shape: f32[1,32], index: 9, kind: input, shape index: {}]   ;;  %s3588_s10 = inlined_call_operand.vmem [shape: f32[32,32], index: 10, kind: input, shape index: {}]   ;;  %s3589_s11 = inlined_call_operand.vmem [shape: f32[1,32], index: 11, kind: input, shape index: {}]   ;;  %s3590_s12 = inlined_call_operand.vmem [shape: f32[1,32], index: 12, kind: input, shape index: {}]   ;;  %s3591_s13 = inlined_call_operand.vmem [shape: f32[1,32], index: 13, kind: input, shape index: {}]   ;;  %s3592_s14 = inlined_call_operand.vmem [shape: f32[32,128], index: 14, kind: input, shape index: {}]   ;;  %s3593_s15 = inlined_call_operand.vmem [shape: f32[1,128], index: 15, kind: input, shape index: {}]   ;;  %s3594_s16 = inlined_call_operand.vmem [shape: f32[128,32], index: 16, kind: input, shape index: {}]   ;;  %s3595_s17 = inlined_call_operand.vmem [shape: f32[1,32], index: 17, kind: input, shape index: {}]   ;;  %s3596_s18 = inlined_call_operand.hbm [shape: f32[2,8,32], index: 18, kind: output, shape index: {}]  }
   0x1   :  { %3606 = sst [smem:[#allocation19_spill]] %s3578_s0 }
   0x2   :  { %3607 = sst [smem:[#allocation20_spill]] %s3579_s1 }
   0x3   :  { %3608 = sst [smem:[#allocation21_spill]] %s3580_s2 }
   0x4   :  { %3609 = sst [smem:[#allocation22_spill]] %s3581_s3 }
   0x5   :  { %3610 = sst [smem:[#allocation23_spill]] %s3593_s15 }
   0x6   :  { %3611 = sst [smem:[#allocation24_spill]] %s3594_s16 }
   0x7   :  { %3612 = sst [smem:[#allocation25_spill]] %s3595_s17 }
   0x8   :  { %3613 = sst [smem:[#allocation26_spill]] %s3596_s18 }
   0x9   :  { %23 = vsyncpa [#allocation3], 0 }
   0xa   :  { %25 = vsyncpa [#allocation3 + $0x1], 0 }
   0xb   :  { %26 = vsyncpa [#allocation6], 0 }
   0xc   :  { %28 = vsyncpa [#allocation6 + $0x1], 0 }
   0xd   :  { %29 = vsyncpa [#allocation4], 0 }
   0xe   :  { %31 = vsyncpa [#allocation4 + $0x1], 0  ;;  %s3150_s27 = smov 0   ;;  %s3152_s28 = smov 0  }
   0xf   :  { %s3154_s29 = smov 0   ;;  %s3156_s30 = smov 0  }
  0x10   :  { %s3158_s0 = smov 0   ;;  %s3160_s19 = smov 0  }
  0x11 LB: > { %3614 = sst [smem:[#allocation11_spill]] %s3020_s27  ;;  %s2563_s1 = sadd.s32 4294967295, %s3040_s19   ;;  %s3040_s19 = sphi %s3160_s19, %s37_s19   ;;  %s3036_s0 = sphi %s3158_s0, %s3645_s0   ;;  %s3032_s30 = sphi %s3156_s30, %s3644_s30   ;;  %s3028_s29 = sphi %s3154_s29, %s3643_s29   ;;  %s3024_s28 = sphi %s3152_s28, %s3647_s28   ;;  %s3020_s27 = sphi %s3150_s27, %s3646_s27  }
  0x12   : > { %3615 = sst [smem:[#allocation12_spill]] %s3028_s29  ;;  %s2564_s20 = sadd.s32 4294967294, %s3040_s19  }
  0x13   : > { %3616 = sst [smem:[#allocation13_spill]] %s3032_s30  ;;  %s49_s21 = sadd.s32 1, %s3036_s0 }
  0x14   : > { %3617 = sst [smem:[#allocation14_spill]] %s3036_s0  ;;  %s58_s22 = sadd.s32 1, %s3028_s29 }
  0x15   : > { %p51_p0 = scmp.ge.s32.totalorder %s49_s21, 2  ;;  %p65_p1 = scmp.ne.s32.totalorder %s3028_s29, %s3024_s28 }
  0x16   : > { %p66_p2 = scmp.eq.s32.totalorder %s3040_s19, 0  ;;  %p71_p3 = scmp.ne.s32.totalorder %s3024_s28, %s3020_s27 }
  0x17   : > { %s3649_s21 = smov (%p51_p0, %s49_s21), 0  ;;  %p72_p5 = scmp.eq.s32.totalorder %s2563_s1, 0 }
  0x18   : > { %3618 = sst [smem:[#allocation15_spill]] %s3649_s21  ;;  %p3191_p4 = por %p66_p2, %p65_p1 }
  0x19   : > { %s53_s23 = ssub.s32 %s3036_s0, %s3649_s21  ;;  %p459_p6 = scmp.eq.s32.totalorder %s2563_s1, 1 }
  0x1a   : > { %p56_p7 = scmp.eq.s32.totalorder %s53_s23, 0  ;;  %p3197_p8 = por %p72_p5, %p71_p3 }
  0x1b   : > { %p3201_p9 = por %p459_p6, %p65_p1  ;;  %p465_p10 = scmp.eq.s32.totalorder %s2564_s20, 1 }
  0x1c   : > { %s3206_s26 = scalar_select %p56_p7, %s3028_s29, %s58_s22  }
  0x1d   : > { %s3621_s25 = scalar_select %p3201_p9, 1, 0 }
  0x1e   : > { %3623 = sst [smem:[#allocation17_spill]] %s3206_s26  ;;  %p3208_p11 = por %p465_p10, %p71_p3 }
  0x1f   : > { %3622 = sst [smem:[#allocation16_spill]] %s3621_s25  ;;  %p2814_p13 = scmp.lt.s32.totalorder %s3040_s19, 2 }
  0x20   : > { %s3624_s27 = scalar_select %p3208_p11, 1, 0 }
  0x21   : > { %s3215_s1 = sand.u32 1, %s3028_s29   ;;  %s2568_s21 = sshll.u32 %s3036_s0, 7 }
  0x22   : > { %3625 = sst [smem:[#allocation18_spill]] %s3624_s27  ;;  %s2567_s23 = sshll.u32 %s3215_s1, 3 }
  0x23   : > { %s3626_s30 = sld [smem:[#allocation19_spill]]  ;;  %s537_s25 = scalar_lea.vmem [#allocation2], %s2567_s23 }
  0x24   : > { %s545_s20 = sshll.u32 %s537_s25, 4  ;;  %p3224_p0 = pnand %p2814_p13, %p3191_p4  ;;  %s546_s20 = int_to_ptr.vmem [resolvable:$true] %s545_s20 }
  0x25   : > { %p2571_p1 = scmp.ge.s32.totalorder %s3040_s19, 1  ;;  %p568_p2 = scmp.lt.s32.totalorder %s3040_s19, 3 }
  0x26   : > { %s534_s26 = scalar_lea.sflag [#allocation3], %s3215_s1  ;;  %p2902_p3 = pneg %p3224_p0 }
  0x27   : > { %s2913_s0 = scalar_lea.vmem %s546_s20, 128  ;;  %s3042_s17 = smov [#allocation2]  }
  0x28   : > { %p2914_p5 = scmp.ne.s32.totalorder %s546_s20, %s2913_s0  ;;  %s2918_s18 = sshll.u32 %s3042_s17, 4  ;;  %s2919_s18 = int_to_ptr.vmem [resolvable:$false] %s2918_s18 }
  0x29   : > { %s543_s15 = scalar_lea.hbm %s3626_s30, %s2568_s21  ;;  %s2920_s30 = scalar_lea.vmem %s2919_s18, 256 }
  0x2a   : > { %p2916_p6 = pnand %p2914_p5, %p2902_p3  ;;  %p2921_p4 = scmp.lt.s32.totalorder %s546_s20, %s2919_s18 }
  0x2b   : > { %p2922_p10 = scmp.lt.s32.totalorder %s2920_s30, %s2913_s0 }
  0x2c   : > { %p2917_p7 = pneg %p2916_p6 }
  0x2d   : > { %p2923_p13 = por %p2922_p10, %p2921_p4 }
  0x2f   : > { %p2924_p12 = pnand %p2923_p13, %p2917_p7 }
  0x31   : > { %2927 = shalt.err (!%p2924_p12)
}
  0x32   : > { %2806 = dma.hbm_to_vmem [thread:$0]  (!%p3224_p0), %s543_s15, 128, %s546_s20, %s534_s26  }
  0x33   : > { %p3242_p5 = pnand %p2571_p1, %p568_p2  ;;  %s3629_s18 = sld [smem:[#allocation20_spill]] }
  0x34   : > { %s556_s30 = scalar_lea.vmem [#allocation5], %s2567_s23  ;;  %s553_s27 = scalar_lea.sflag [#allocation6], %s3215_s1 }
  0x35   : > { %s563_s29 = sshll.u32 %s556_s30, 4  ;;  %s3043_s15 = smov [#allocation5]   ;;  %s564_s29 = int_to_ptr.vmem [resolvable:$true] %s563_s29 }
  0x36   : > { %s2941_s16 = scalar_lea.vmem %s564_s29, 128  ;;  %s2946_s26 = sshll.u32 %s3043_s15, 4  ;;  %s2947_s26 = int_to_ptr.vmem [resolvable:$false] %s2946_s26 }
  0x37   : > { %p2942_p12 = scmp.ne.s32.totalorder %s564_s29, %s2941_s16  ;;  %s2948_s20 = scalar_lea.vmem %s2947_s26, 256 }
  0x38   : > { %p2949_p1 = scmp.lt.s32.totalorder %s564_s29, %s2947_s26  ;;  %p2950_p2 = scmp.lt.s32.totalorder %s2948_s20, %s2941_s16 }
  0x39   : > { %s561_s0 = scalar_lea.hbm %s3629_s18, %s2568_s21  ;;  %p2944_p6 = pnand %p2942_p12, %p2902_p3 }
  0x3a   : > { %p2951_p4 = por %p2950_p2, %p2949_p1 }
  0x3b   : > { %p2945_p7 = pneg %p2944_p6 }
  0x3d   : > { %p2952_p10 = pnand %p2951_p4, %p2945_p7 }
  0x3f   : > { %2955 = shalt.err (!%p2952_p10)
}
  0x40   : > { %2809 = dma.hbm_to_vmem [thread:$0]  (!%p3224_p0), %s561_s0, 128, %s564_s29, %s553_s27  }
  0x41   : > { %572 = sbr.rel (%p3242_p5) target bundleno = 2763 (0xacb), region = 92  ;;  %s3258_s21 = sand.u32 (!%p3242_p5), 1, %s3024_s28  }
  0x42   : > { %s3261_s1 = sshll.u32 (!%p3242_p5), %s3258_s21, 3  ;;  %s575_s23 = scalar_lea.sflag (!%p3242_p5), [#allocation3], %s3258_s21 }
  0x43   : > { %s578_s16 = scalar_lea.vmem (!%p3242_p5), [#allocation2], %s3261_s1 }
  0x46   : > { %3007 = dma.done.wait (%p3197_p8), %s575_s23, 128  }
  0x47   : > { %3009 = vsyncadd (%p3197_p8), %s575_s23, 4294967168  ;;  %s584_s27 = scalar_lea.sflag [#allocation6], %s3258_s21  ;;  %s587_s29 = scalar_lea.vmem [#allocation5], %s3261_s1 }
  0x48   : > { %3011 = dma.done.wait (%p3197_p8), %s584_s27, 128  }
  0x49   : > { %3013 = vsyncadd (%p3197_p8), %s584_s27, 4294967168  ;;  %vm649_vm0 = vcmask 261120   ;;  %v3275_v0 = vld [vmem:[%s578_s16] sm:$0xff]  ;;  %v646_v1 = vld [vmem:[%s587_s29] sm:$0xff]  ;;  %v3044_v15 = vmov 0.0   ;;  %vm3045_vm1 = vmmov 0  }
  0x4a   : > { %v650_v2 = vsel %vm649_vm0, %v3275_v0, 0.0  ;;  %v678_v3 = vsel %vm649_vm0, %v646_v1, 0.0  ;;  %v696_v14 = vld [vmem:[%s3582_s4 + $0x18] sm:$0xff]  ;;  %2667 = vmatprep.subr.mxu1 %v3044_v15  ;;  %v695_v16 = vld [vmem:[%s3582_s4 + $0x10] sm:$0xff]  ;;  %2675 = vmatprep.mubr.msk.f32.mxu1 %vm3045_vm1, %v3044_v15  ;;  %v694_v17 = vld [vmem:[%s3582_s4 + $0x8] sm:$0xff]  ;;  %s3630_s20 = sld [smem:[#allocation21_spill]] }
  0x4b   : > { %651 = vadd.xlane.f32.xlu0 %v650_v2  ;;  %2668 = vmatpush3.msra.mxu1 %v696_v14  ;;  %v693_v18 = vld [vmem:[%s3582_s4] sm:$0xff]  ;;  %s3631_s3 = sld [smem:[#allocation22_spill]]  ;;  %v780_v33 = vld [vmem:[%s3584_s6 + $0x18] sm:$0xff]  ;;  %v779_v34 = vld [vmem:[%s3584_s6 + $0x10] sm:$0xff]  ;;  %s3046_s25 = smov 112   ;;  %vm1098_vm2 = vcmask 64512  }
  0x4c   : > { %2710 = vmatprep.subr.mxu0 %v3044_v15  ;;  %2669 = vmatprep.subr.mxu1 %v3044_v15  ;;  %v778_v36 = vld [vmem:[%s3584_s6 + $0x8] sm:$0xff]  ;;  %v777_v37 = vld [vmem:[%s3584_s6] sm:$0xff]  ;;  %v864_v39 = vld [vmem:[%s3586_s8 + $0x18] sm:$0xff]  ;;  %s3047_s17 = smov 120   ;;  %s3048_s18 = smov 104   ;;  %vm2140_vm3 = vcmask 130048  }
  0x4d   : > { %2712 = vmatprep.mubr.msk.f32.mxu0 %vm3045_vm1, %v3044_v15  ;;  %2670 = vmatpush3.msra.mxu1 %v695_v16  ;;  %v863_v40 = vld [vmem:[%s3586_s8 + $0x10] sm:$0xff]  ;;  %v862_v41 = vld [vmem:[%s3586_s8 + $0x8] sm:$0xff]  ;;  %v861_v42 = vld [vmem:[%s3586_s8] sm:$0xff]  ;;  %s3051_s22 = smov 16   ;;  %s3052_s2 = smov 8   ;;  %vm2142_vm4 = vcmask 195584  }
  0x4e   : > { %2671 = vmatprep.subr.mxu1 %v3044_v15  ;;  %v2577_v45 = vld [vmem:[%s3583_s5] ss:$0 sm:$0xff]  ;;  %s3634_s23 = sld [smem:[#allocation13_spill]] }
  0x4f   : > { %679 = vadd.xlane.f32.xlu0 %v678_v3  ;;  %2672 = vmatpush3.msra.mxu1 %v694_v17  ;;  %v2579_v46 = vld [vmem:[%s3585_s7] ss:$0 sm:$0xff]  ;;  %s3636_s24 = sld [smem:[#allocation25_spill]] }
  0x50   : > { %2673 = vmatprep.subr.mxu1 %v3044_v15  ;;  %v2575_v26 = vld [vmem:[%s3630_s20] ss:$0 sm:$0xff]  ;;  %s3633_s20 = sld [smem:[#allocation23_spill]] }
  0x51   : > { %2674 = vmatpush3.msra.mxu1 %v693_v18  ;;  %v2576_v28 = vld [vmem:[%s3631_s3] ss:$0 sm:$0xff]  ;;  %s3637_s30 = sld [smem:[#allocation26_spill]] }
  0x52   : > { %2678 = vmatprep.subr.mxu1 %v3044_v15 }
  0x57   : > { %s3638_s15 = smov %s3637_s30 }
  0xd4   : > { %v652_v4 = vpop.xlane.xlu0 %651 }
  0xd5   : > { %v654_v5 = vmul.f32 0.03125, %v652_v4 }
  0xd7   : > { %v655_v6 = vsub.f32 %v3275_v0, %v654_v5 }
  0xd8   : > { %v680_v7 = vpop.xlane.xlu0 %679 }
  0xd9   : > { %v681_v8 = vmul.f32 0.03125, %v680_v7  ;;  %v656_v9 = vmul.f32 %v655_v6, %v655_v6 }
  0xdb   : > { %v682_v10 = vsub.f32 %v646_v1, %v681_v8  ;;  %v657_v11 = vsel %vm649_vm0, %v656_v9, 0.0 }
  0xdc   : > { %658 = vadd.xlane.f32.xlu1 %v657_v11 }
  0xdd   : > { %v683_v12 = vmul.f32 %v682_v10, %v682_v10 }
  0xdf   : > { %v684_v13 = vsel %vm649_vm0, %v683_v12, 0.0 }
  0xe0   : > { %685 = vadd.xlane.f32.xlu1 %v684_v13  ;;  %v2581_v13 = vld [vmem:[%s3587_s9] ss:$0 sm:$0xff] }
 0x165   : > { %v659_v19 = vpop.xlane.xlu1 %658 }
 0x166   : > { %v660_v20 = vmul.f32 0.03125, %v659_v19 }
 0x168   : > { %v661_v21 = vadd.f32 1e-05, %v660_v20 }
 0x169   : > { %v686_v22 = vpop.xlane.xlu1 %685 }
 0x16a   : > { %2874 = vrsqrt.f32 %v661_v21  ;;  %v687_v23 = vmul.f32 0.03125, %v686_v22 }
 0x16c   : > { %v688_v24 = vadd.f32 1e-05, %v687_v23 }
 0x16e   : > { %2876 = vrsqrt.f32 %v688_v24 }
 0x177   : > { %v2875_v25 = vpop.eup %2874 }
 0x178   : > { %v663_v27 = vmul.f32 %v2875_v25, %v655_v6 }
 0x17a   : > { %v670_v29 = vmul.f32 %v2575_v26, %v663_v27 }
 0x17b   : > { %v2877_v30 = vpop.eup %2876 }
 0x17c   : > { %v677_v31 = vadd.f32 %v2576_v28, %v670_v29  ;;  %v690_v32 = vmul.f32 %v2877_v30, %v682_v10 }
 0x17e   : > { %2676 = vmatmul.mubr.msk.f32.vlgmr.msra.gmra.mxu1 %vm649_vm0, %v677_v31  ;;  %v691_v35 = vmul.f32 %v2575_v26, %v690_v32 }
 0x17f   : > { %2679 = vmatpush3.msra.mxu1 %v780_v33  ;;  %2686 = vmatprep.mubr.msk.f32.mxu1 %vm3045_vm1, %v3044_v15 }
 0x180   : > { %2680 = vmatprep.subr.mxu1 %v3044_v15  ;;  %v692_v38 = vadd.f32 %v2576_v28, %v691_v35 }
 0x181   : > { %2681 = vmatpush3.msra.mxu1 %v779_v34 }
 0x182   : > { %2682 = vmatprep.subr.mxu1 %v3044_v15 }
 0x183   : > { %2683 = vmatpush3.msra.mxu1 %v778_v36 }
 0x184   : > { %2684 = vmatprep.subr.mxu1 %v3044_v15 }
 0x185   : > { %2685 = vmatpush3.msra.mxu1 %v777_v37 }
 0x186   : > { %2687 = vmatmul.mubr.msk.f32.vlgmr.msra.gmra.mxu1 %vm649_vm0, %v692_v38  ;;  %2689 = vmatprep.subr.mxu1 %v3044_v15 }
 0x187   : > { %2690 = vmatpush3.msra.mxu1 %v864_v39  ;;  %2697 = vmatprep.mubr.msk.f32.mxu1 %vm3045_vm1, %v3044_v15 }
 0x188   : > { %2691 = vmatprep.subr.mxu1 %v3044_v15 }
 0x189   : > { %2692 = vmatpush3.msra.mxu1 %v863_v40 }
 0x18a   : > { %2693 = vmatprep.subr.mxu1 %v3044_v15 }
 0x18b   : > { %2694 = vmatpush3.msra.mxu1 %v862_v41 }
 0x18c   : > { %2695 = vmatprep.subr.mxu1 %v3044_v15 }
 0x18d   : > { %2696 = vmatpush3.msra.mxu1 %v861_v42 }
 0x18e   : > { %2698 = vmatmul.mubr.msk.f32.vlgmr.msra.gmra.mxu1 %vm649_vm0, %v692_v38  ;;  %2700 = vmatprep.subr.mxu1 %v3044_v15 }
 0x18f   : > { %2702 = vmatprep.mubr.msk.f32.mxu1 %vm3045_vm1, %v3044_v15 }
 0x23e   : > { %v773_v43 = vpop.f32.mrf.mxu1 }
 0x23f   : > { %v774_v48 = vadd.f32 %v2577_v45, %v773_v43 }
 0x240   : > { %v2677_v44 = vpop.f32.mrf.mxu1 }
 0x241   : > { %v942_v51 = vmul.f32 0.35355338, %v774_v48 }
 0x246   : > { %v857_v47 = vpop.f32.mrf.mxu1 }
 0x247   : > { %v858_v49 = vadd.f32 %v2579_v46, %v857_v47 }
 0x248   : > { %v2688_v50 = vpop.f32.mrf.mxu1 }
 0x249   : > { %954 = vrot.lane.b32.xlu1 %v858_v49, %s3046_s25  ;;  %951 = vrot.lane.b32.xlu0 %v858_v49, %s3047_s17 }
 0x24d   : > { %957 = vrot.lane.b32.xlu1 %v858_v49, %s3048_s18  ;;  %946 = vrot.lane.b32.xlu0 %v942_v51, %s3046_s25 }
 0x24e   : > { %v938_v52 = vpop.f32.mrf.mxu1 }
 0x24f   : > { %v939_v14 = vadd.f32 %v2581_v13, %v938_v52 }
 0x250   : > { %v2699_v53 = vpop.f32.mrf.mxu1 }
 0x251   : > { %944 = vrot.lane.b32.xlu1 %v942_v51, %s3047_s17 }
 0x255   : > { %948 = vrot.lane.b32.xlu1 %v942_v51, %s3048_s18 }
 0x26b   : > { %970 = vxpose.xlu0.b32.start.end [1/1] (short) (narrow) %v858_v49, 8 }
 0x2bb   : > { %v955_v54 = vpop.permute.xlu1 %954  ;;  %v952_v55 = vpop.permute.xlu0 %951 }
 0x2bc   : > { %1034 = vxpose.xlu0.b32.start.end [1/1] (short) (narrow) %v955_v54, 8  ;;  %1002 = vxpose.xlu1.b32.start.end [1/1] (short) (narrow) %v952_v55, 8 }
 0x2bf   : > { %v958_v56 = vpop.permute.xlu1 %957  ;;  %v947_v57 = vpop.permute.xlu0 %946 }
 0x2c0   : > { %1066 = vxpose.xlu0.b32.start.end [1/1] (short) (narrow) %v958_v56, 8 }
 0x2c3   : > { %v945_v59 = vpop.permute.xlu1 %944 }
 0x2c7   : > { %v949_v60 = vpop.permute.xlu1 %948 }
 0x2e7   : > { %v986_v58 = vpop.trf.xlu0 }
 0x2e8   : > { %2701 = vmatpush3.msra.mxu1 %v986_v58 }
 0x2e9   : > { %2703 = vmatmul.mubr.msk.f32.vlgmr.msra.gmra.mxu1 %vm1098_vm2, %v942_v51  ;;  %2705 = vmatprep.subr.mxu1 %v3044_v15 }
 0x2ea   : > { %2707 = vmatprep.mubr.msk.f32.mxu1 %vm3045_vm1, %v3044_v15 }
 0x338   : > { %v1018_v61 = vpop.trf.xlu1  ;;  %v1050_v62 = vpop.trf.xlu0 }
 0x339   : > { %2706 = vmatpush3.msra.mxu1 %v1018_v61  ;;  %2711 = vmatpush3.msra.mxu0 %v1050_v62 }
 0x33a   : > { %2708 = vmatmul.mubr.msk.f32.vlgmr.msra.gmra.mxu1 %vm1098_vm2, %v945_v59  ;;  %2713 = vmatmul.mubr.msk.f32.vlgmr.msra.gmra.mxu0 %vm1098_vm2, %v947_v57 }
 0x33b   : > { %2715 = vmatprep.subr.mxu1 %v3044_v15  ;;  %2717 = vmatprep.mubr.msk.f32.mxu1 %vm3045_vm1, %v3044_v15 }
 0x33c   : > { %v1082_v63 = vpop.trf.xlu0  ;;  %2720 = vmatprep.subr.mxu0 %v3044_v15  ;;  %2722 = vmatprep.mubr.msk.f32.mxu0 %vm3045_vm1, %v3044_v15 }
 0x33d   : > { %2716 = vmatpush3.msra.mxu1 %v1082_v63  ;;  %v2147_v63 = vld [vmem:[%s3588_s10 + $0x18] sm:$0xff] }
 0x33e   : > { %2718 = vmatmul.mubr.msk.f32.vlgmr.msra.gmra.mxu1 %vm1098_vm2, %v949_v60  ;;  %2725 = vmatprep.subr.mxu1 %v3044_v15 }
 0x33f   : > { %2727 = vmatprep.mubr.msk.f32.mxu1 %vm3045_vm1, %v3044_v15 }
 0x3a9   : > { %v1167_v1 = vpop.f32.mrf.mxu1 }
 0x3aa   : > { %v1387_v2 = vsel %vm1098_vm2, %v1167_v1, -inf }
 0x3ab   : > { %1388 = vmax.xlane.f32.xlu0 %v1387_v2  ;;  %v2704_v3 = vpop.f32.mrf.mxu1  ;;  %v3049_v2 = vmov 1983009808  }
 0x3ac   : > { %v1994_v3 = vunpack.c.l.s4 %v3049_v2 }
 0x3fa   : > { %v1239_v4 = vpop.f32.mrf.mxu1  ;;  %v1311_v5 = vpop.f32.mrf.mxu0 }
 0x3fb   : > { %v1393_v6 = vsel %vm1098_vm2, %v1311_v5, -inf  ;;  %v1390_v7 = vsel %vm1098_vm2, %v1239_v4, -inf }
 0x3fc   : > { %v2714_v8 = vpop.f32.mrf.mxu0  ;;  %1394 = vmax.xlane.f32.xlu0 %v1393_v6  ;;  %1391 = vmax.xlane.f32.xlu1 %v1390_v7  ;;  %v2709_v9 = vpop.f32.mrf.mxu1  ;;  %v1995_v7 = vunpack.c.0.s8 %v1994_v3 }
 0x3fe   : > { %v1383_v10 = vpop.f32.mrf.mxu1 }
 0x3ff   : > { %v1396_v11 = vsel %vm1098_vm2, %v1383_v10, -inf }
 0x400   : > { %1397 = vmax.xlane.f32.xlu1 %v1396_v11  ;;  %v2719_v12 = vpop.f32.mrf.mxu1 }
 0x411   : > { %964 = vrot.lane.b32.xlu1 %v939_v14, %s3046_s25  ;;  %s3053_s25 = smov 24  }
 0x412   : > { %961 = vrot.lane.b32.xlu0 %v939_v14, %s3047_s17 }
 0x416   : > { %967 = vrot.lane.b32.xlu0 %v939_v14, %s3048_s18  ;;  %s3632_s18 = sld [smem:[#allocation24_spill]] }
 0x434   : > { %v1389_v16 = vpop.xlane.xlu0 %1388 }
 0x435   : > { %v1399_v17 = vsub.f32 %v1167_v1, %v1389_v16 }
 0x437   : > { %v1403_v18 = vmul.f32 1.442695, %v1399_v17 }
 0x439   : > { %2878 = vpow2.f32 %v1403_v18 }
 0x446   : > { %v2879_v19 = vpop.eup %2878 }
 0x447   : > { %v1411_v20 = vsel %vm1098_vm2, %v2879_v19, 0.0 }
 0x448   : > { %1412 = vadd.xlane.f32.xlu1 %v1411_v20 }
 0x485   : > { %v1395_v21 = vpop.xlane.xlu0 %1394  ;;  %v1392_v22 = vpop.xlane.xlu1 %1391 }
 0x486   : > { %v1401_v23 = vsub.f32 %v1311_v5, %v1395_v21  ;;  %v1400_v24 = vsub.f32 %v1239_v4, %v1392_v22  ;;  %v1996_v4 = vlaneseq  ;;  %v3050_v5 = vmov 1934713408  }
 0x487   : > { %v2026_v6 = vunpack.c.l.s4 %v3050_v5 }
 0x488   : > { %v1405_v25 = vmul.f32 1.442695, %v1400_v24  ;;  %v1407_v26 = vmul.f32 1.442695, %v1401_v23  ;;  %v1997_v8 = vshrl.u32 %v1996_v4, 7 }
 0x489   : > { %v1398_v27 = vpop.xlane.xlu1 %1397  ;;  %v962_v36 = vpop.permute.xlu0 %961  ;;  %v2027_v11 = vunpack.c.0.s8 %v2026_v6 }
 0x48a   : > { %v1402_v28 = vsub.f32 %v1383_v10, %v1398_v27  ;;  %2880 = vpow2.f32 %v1405_v25  ;;  %v1998_v12 = vsub.s32 %v1995_v7, %v1997_v8 }
 0x48b   : > { %2882 = vpow2.f32 %v1407_v26 }
 0x48c   : > { %v1409_v29 = vmul.f32 1.442695, %v1402_v28  ;;  %v2146_v28 = vld [vmem:[%s3588_s10 + $0x10] sm:$0xff] }
 0x48d   : > { %v965_v37 = vpop.permute.xlu1 %964  ;;  %v968_v38 = vpop.permute.xlu0 %967 }
 0x48e   : > { %2884 = vpow2.f32 %v1409_v29  ;;  %v2145_v29 = vld [vmem:[%s3588_s10 + $0x8] sm:$0xff] }
 0x497   : > { %v2881_v30 = vpop.eup %2880 }
 0x498   : > { %v1414_v31 = vsel %vm1098_vm2, %v2881_v30, 0.0  ;;  %v2883_v32 = vpop.eup %2882 }
 0x499   : > { %1415 = vadd.xlane.f32.xlu1 %v1414_v31  ;;  %v1417_v35 = vsel %vm1098_vm2, %v2883_v32, 0.0 }
 0x49b   : > { %v2885_v33 = vpop.eup %2884 }
 0x49c   : > { %v1420_v34 = vsel %vm1098_vm2, %v2885_v33, 0.0 }
 0x49d   : > { %1421 = vadd.xlane.f32.xlu0 %v1420_v34  ;;  %1418 = vadd.xlane.f32.xlu1 %v1417_v35 }
 0x4ca   : > { %1431 = vxpose.xlu0.b32.start.end [1/1] (short) (narrow) %v939_v14, 8 }
 0x4ce   : > { %1495 = vxpose.xlu0.b32.start.end [1/1] (short) (narrow) %v965_v37, 8 }
 0x4d0   : > { %1463 = vxpose.xlu1.b32.start.end [1/1] (short) (narrow) %v962_v36, 8 }
 0x4d1   : > { %v1413_v39 = vpop.xlane.xlu1 %1412 }
 0x4d2   : > { %2886 = vrcp.f32 %v1413_v39  ;;  %1527 = vxpose.xlu0.b32.start.end [1/1] (short) (narrow) %v968_v38, 8  ;;  %v2144_v38 = vld [vmem:[%s3588_s10] sm:$0xff] }
 0x4df   : > { %v2887_v40 = vpop.eup %2886 }
 0x4e0   : > { %v1427_v41 = vmul.f32 %v2887_v40, %v2879_v19  ;;  %v2030_v19 = vsub.s32 %v2027_v11, %v1997_v8  ;;  %v2258_v11 = vld [vmem:[%s3592_s14] sm:$0xff] }
 0x4e2   : > { %2721 = vmatpush3.xpose.msk.msra.mxu0 %vm1098_vm2, %v1427_v41 }
 0x4e3   : > { %2730 = vmatprep.subr.mxu0 %v3044_v15 }
 0x522   : > { %v1416_v42 = vpop.xlane.xlu1 %1415 }
 0x523   : > { %2888 = vrcp.f32 %v1416_v42 }
 0x526   : > { %v1419_v45 = vpop.xlane.xlu1 %1418  ;;  %v1422_v46 = vpop.xlane.xlu0 %1421 }
 0x527   : > { %2890 = vrcp.f32 %v1419_v45 }
 0x528   : > { %2892 = vrcp.f32 %v1422_v46 }
 0x530   : > { %v2889_v43 = vpop.eup %2888 }
 0x531   : > { %v1428_v44 = vmul.f32 %v2889_v43, %v2881_v30 }
 0x533   : > { %2726 = vmatpush3.xpose.msk.msra.mxu1 %vm1098_vm2, %v1428_v44 }
 0x534   : > { %2735 = vmatprep.subr.mxu1 %v3044_v15  ;;  %v2891_v47 = vpop.eup %2890 }
 0x535   : > { %v1429_v49 = vmul.f32 %v2891_v47, %v2883_v32  ;;  %v2893_v50 = vpop.eup %2892 }
 0x536   : > { %v1430_v53 = vmul.f32 %v2893_v50, %v2885_v33 }
 0x546   : > { %v1447_v48 = vpop.trf.xlu0 }
 0x547   : > { %2723 = vmatmul.mubr.msk.f32.vlgmr.msra.gmra.mxu0 %vm1098_vm2, %v1447_v48 }
 0x548   : > { %2731 = vmatpush3.xpose.msk.msra.mxu0 %vm1098_vm2, %v1429_v49  ;;  %2732 = vmatprep.mubr.msk.f32.mxu0 %vm3045_vm1, %v3044_v15 }
 0x549   : > { %2740 = vmatprep.subr.mxu0 %v3044_v15 }
 0x54a   : > { %v1511_v51 = vpop.trf.xlu0 }
 0x54b   : > { %2733 = vmatmul.mubr.msk.f32.vlgmr.msra.gmra.mxu0 %vm1098_vm2, %v1511_v51 }
 0x54c   : > { %2748 = vmatprep.mubr.msk.f32.mxu0 %vm3045_vm1, %v3044_v15  ;;  %v1479_v52 = vpop.trf.xlu1  ;;  %2741 = vmatpush3.msra.mxu0 %v2147_v63 }
 0x54d   : > { %2728 = vmatmul.mubr.msk.f32.vlgmr.msra.gmra.mxu1 %vm1098_vm2, %v1479_v52  ;;  %2742 = vmatprep.subr.mxu0 %v3044_v15 }
 0x54e   : > { %2736 = vmatpush3.xpose.msk.msra.mxu1 %vm1098_vm2, %v1430_v53  ;;  %v1543_v54 = vpop.trf.xlu0  ;;  %2737 = vmatprep.mubr.msk.f32.mxu1 %vm3045_vm1, %v3044_v15 }
 0x54f   : > { %2751 = vmatprep.subr.mxu1 %v3044_v15  ;;  %2743 = vmatpush3.msra.mxu0 %v2146_v28  ;;  %v2359_v28 = vld [vmem:[%s3632_s18 + $0x48] sm:$0xff] }
 0x550   : > { %2744 = vmatprep.subr.mxu0 %v3044_v15 }
 0x551   : > { %2738 = vmatmul.mubr.msk.f32.vlgmr.msra.gmra.mxu1 %vm1098_vm2, %v1543_v54  ;;  %2745 = vmatpush3.msra.mxu0 %v2145_v29  ;;  %v2358_v29 = vld [vmem:[%s3632_s18 + $0x40] sm:$0xff] }
 0x552   : > { %2759 = vmatprep.mubr.msk.f32.mxu1 %vm3045_vm1, %v3044_v15  ;;  %2746 = vmatprep.subr.mxu0 %v3044_v15 }
 0x553   : > { %2747 = vmatpush3.msra.mxu0 %v2144_v38  ;;  %v2601_v38 = vld [vmem:[%s3633_s20] ss:$0 sm:$0xff]  ;;  %s2446_s20 = scalar_lea.sflag [#allocation4], %s3258_s21 }
 0x554   : > { %2762 = vmatprep.subr.mxu0 %v3044_v15 }
 0x607   : > { %v1631_v55 = vpop.f32.mrf.mxu0 }
 0x608   : > { %1863 = vxpose.xlu0.b32.start.end [1/1] (short) (narrow) %v1631_v55, 8 }
 0x609   : > { %v2724_v56 = vpop.f32.mrf.mxu0 }
 0x60b   : > { %v1783_v57 = vpop.f32.mrf.mxu0 }
 0x60c   : > { %1927 = vxpose.xlu0.b32.start.end [1/1] (short) (narrow) %v1783_v57, 8 }
 0x60d   : > { %v2734_v58 = vpop.f32.mrf.mxu0  ;;  %v1707_v59 = vpop.f32.mrf.mxu1 }
 0x60e   : > { %1895 = vxpose.xlu1.b32.start.end [1/1] (short) (narrow) %v1707_v59, 8 }
 0x60f   : > { %v2729_v60 = vpop.f32.mrf.mxu1 }
 0x611   : > { %v1859_v61 = vpop.f32.mrf.mxu1 }
 0x612   : > { %1959 = vxpose.xlu1.b32.start.end [1/1] (short) (narrow) %v1859_v61, 8  ;;  %v2597_v61 = vld [vmem:[%s3589_s11] ss:$0 sm:$0xff] }
 0x613   : > { %v2739_v62 = vpop.f32.mrf.mxu1 }
 0x684   : > { %v1879_v1 = vpop.trf.xlu0 }
 0x688   : > { %v1943_v10 = vpop.trf.xlu0 }
 0x689   : > { %v1991_v13 = vcombine.low %v1879_v1, %v1943_v10  ;;  %v1992_v14 = vcombine.high %v1879_v1, %v1943_v10  ;;  %v2259_v10 = vld [vmem:[%s3592_s14 + $0x8] sm:$0xff] }
 0x68a   : > { %v1911_v9 = vpop.trf.xlu1 }
 0x68b   : > { %v1999_v20 = vrot.slane %v1991_v13, %v1998_v12  ;;  %v2006_v21 = vrot.slane %v1992_v14, %v1998_v12 }
 0x68e   : > { %v1975_v16 = vpop.trf.xlu1 }
 0x68f   : > { %v2007_v17 = vcombine.low %v1911_v9, %v1975_v16  ;;  %v2008_v18 = vcombine.high %v1911_v9, %v1975_v16  ;;  %v2261_v9 = vld [vmem:[%s3592_s14 + $0x18] sm:$0xff] }
 0x690   : > { %2752 = vmatpush3.msra.mxu1 %v2261_v9 }
 0x691   : > { %v2015_v22 = vrot.slane %v2007_v17, %v1998_v12  ;;  %v2022_v23 = vrot.slane %v2008_v18, %v1998_v12  ;;  %2753 = vmatprep.subr.mxu1 %v3044_v15  ;;  %v2599_v17 = vld [vmem:[%s3590_s12] ss:$0 sm:$0xff] }
 0x693   : > { %v2023_v24 = vcombine.low %v1999_v20, %v2015_v22  ;;  %v2024_v25 = vcombine.high %v1999_v20, %v2015_v22  ;;  %v2039_v26 = vcombine.low %v2006_v21, %v2022_v23  ;;  %v2040_v27 = vcombine.high %v2006_v21, %v2022_v23  ;;  %v2365_v22 = vld [vmem:[%s3632_s18 + $0x78] sm:$0xff]  ;;  %v2364_v23 = vld [vmem:[%s3632_s18 + $0x70] sm:$0xff] }
 0x695   : > { %v2031_v30 = vrot.slane %v2023_v24, %v2030_v19  ;;  %v2038_v31 = vrot.slane %v2024_v25, %v2030_v19  ;;  %v2047_v32 = vrot.slane %v2039_v26, %v2030_v19  ;;  %v2054_v33 = vrot.slane %v2040_v27, %v2030_v19  ;;  %v2363_v24 = vld [vmem:[%s3632_s18 + $0x68] sm:$0xff]  ;;  %v2362_v25 = vld [vmem:[%s3632_s18 + $0x60] sm:$0xff]  ;;  %v2361_v26 = vld [vmem:[%s3632_s18 + $0x58] sm:$0xff] }
 0x696   : > { %v2360_v27 = vld [vmem:[%s3632_s18 + $0x50] sm:$0xff] }
 0x697   : > { %v2059_v34 = vcombine.low %v2031_v30, %v2038_v31  ;;  %v2595_v35 = vcombine.high %v2031_v30, %v2038_v31  ;;  %v2075_v36 = vcombine.low %v2047_v32, %v2054_v33  ;;  %v2596_v37 = vcombine.high %v2047_v32, %v2054_v33  ;;  %v2357_v30 = vld [vmem:[%s3632_s18 + $0x38] sm:$0xff]  ;;  %v2356_v31 = vld [vmem:[%s3632_s18 + $0x30] sm:$0xff]  ;;  %v2355_v32 = vld [vmem:[%s3632_s18 + $0x28] sm:$0xff] }
 0x698   : > { %v2354_v33 = vld [vmem:[%s3632_s18 + $0x20] sm:$0xff] }
 0x699   : > { %v2066_v39 = vrot.slane %v2059_v34, %v1998_v12  ;;  %v2074_v40 = vrot.slane %v2595_v35, %v1998_v12  ;;  %v2082_v41 = vrot.slane %v2075_v36, %v1998_v12  ;;  %v2090_v42 = vrot.slane %v2596_v37, %v1998_v12  ;;  %v2353_v34 = vld [vmem:[%s3632_s18 + $0x18] sm:$0xff]  ;;  %v2352_v35 = vld [vmem:[%s3632_s18 + $0x10] sm:$0xff]  ;;  %v2351_v36 = vld [vmem:[%s3632_s18 + $0x8] sm:$0xff] }
 0x69a   : > { %v2350_v37 = vld [vmem:[%s3632_s18] sm:$0xff] }
 0x69b   : > { %v2092_v43 = vcombine.high %v2066_v39, %v2074_v40  ;;  %v2108_v44 = vcombine.high %v2082_v41, %v2090_v42  ;;  %v2091_v45 = vcombine.low %v2066_v39, %v2074_v40  ;;  %v2107_v46 = vcombine.low %v2082_v41, %v2090_v42 }
 0x69d   : > { %v2106_v47 = vrot.slane %v2092_v43, %v2030_v19  ;;  %v2122_v48 = vrot.slane %v2108_v44, %v2030_v19  ;;  %v2099_v49 = vrot.slane %v2091_v45, %v2030_v19  ;;  %v2115_v50 = vrot.slane %v2107_v46, %v2030_v19  ;;  %v2600_v19 = vld [vmem:[%s3591_s13] ss:$0 sm:$0xff] }
 0x69f   : > { %v2125_v51 = vcombine.low %v2106_v47, %v2122_v48  ;;  %v2124_v52 = vcombine.high %v2099_v49, %v2115_v50  ;;  %v2123_v53 = vcombine.low %v2099_v49, %v2115_v50  ;;  %v2126_v54 = vcombine.high %v2106_v47, %v2122_v48 }
 0x6a1   : > { %2132 = vrot.lane.b32.xlu1 %v2125_v51, %s3051_s22  ;;  %2128 = vrot.lane.b32.xlu0 %v2124_v52, %s3052_s2  ;;  %s2606_s22 = sshll.u32 %s3634_s23, 7  ;;  %s644_s2 = scalar_lea.vmem [#allocation7], %s3261_s1 }
 0x6a2   : > { %s2458_s26 = scalar_lea.hbm %s3637_s30, %s2606_s22  ;;  %s3054_s23 = smov [#allocation7]  }
 0x6a3   : > { %s2960_s1 = sshll.u32 %s3054_s23, 4  ;;  %s2961_s1 = int_to_ptr.vmem [resolvable:$false] %s2960_s1 }
 0x6a4   : > { %s2962_s27 = scalar_lea.vmem %s2961_s1, 256 }
 0x6a5   : > { %2136 = vrot.lane.b32.xlu1 %v2126_v54, %s3053_s25  ;;  %s2460_s25 = sshll.u32 %s644_s2, 4  ;;  %s2461_s25 = int_to_ptr.vmem [resolvable:$true] %s2460_s25 }
 0x6a6   : > { %s2956_s3 = scalar_lea.vmem %s2461_s25, 128  ;;  %p2963_p13 = scmp.lt.s32.totalorder %s2461_s25, %s2961_s1 }
 0x6a7   : > { %p2957_p8 = scmp.ne.s32.totalorder %s2461_s25, %s2956_s3  ;;  %p2964_p5 = scmp.lt.s32.totalorder %s2962_s27, %s2956_s3 }
 0x6a9   : > { %p2958_p0 = pnand %p2957_p8, %p3201_p9  ;;  %p2965_p12 = por %p2964_p5, %p2963_p13 }
 0x6ab   : > { %p2959_p3 = pneg %p2958_p0 }
 0x6ad   : > { %p2966_p6 = pnand %p2965_p12, %p2959_p3 }
 0x713   : > { %v2133_v55 = vpop.permute.xlu1 %2132  ;;  %v2129_v56 = vpop.permute.xlu0 %2128 }
 0x714   : > { %v2139_v57 = vsel %vm1098_vm2, %v2123_v53, %v2129_v56 }
 0x715   : > { %v2141_v59 = vsel %vm2140_vm3, %v2139_v57, %v2133_v55 }
 0x717   : > { %v2137_v58 = vpop.permute.xlu1 %2136 }
 0x718   : > { %v2143_v60 = vsel %vm2142_vm4, %v2141_v59, %v2137_v58 }
 0x719   : > { %2749 = vmatmul.mubr.msk.f32.vlgmr.msra.gmra.mxu0 %vm649_vm0, %v2143_v60 }
 0x71a   : > { %2794 = vmatprep.mubr.msk.f32.mxu0 %vm3045_vm1, %v3044_v15  ;;  %2763 = vmatpush3.msra.mxu0 %v2365_v22 }
 0x71b   : > { %2764 = vmatprep.subr.mxu0 %v3044_v15 }
 0x71c   : > { %2765 = vmatpush3.msra.mxu0 %v2364_v23 }
 0x71d   : > { %2766 = vmatprep.subr.mxu0 %v3044_v15 }
 0x71e   : > { %2767 = vmatpush3.msra.mxu0 %v2363_v24 }
 0x71f   : > { %2768 = vmatprep.subr.mxu0 %v3044_v15 }
 0x720   : > { %2769 = vmatpush3.msra.mxu0 %v2362_v25 }
 0x721   : > { %2770 = vmatprep.subr.mxu0 %v3044_v15 }
 0x722   : > { %2771 = vmatpush3.msra.mxu0 %v2361_v26 }
 0x723   : > { %2772 = vmatprep.subr.mxu0 %v3044_v15 }
 0x724   : > { %2773 = vmatpush3.msra.mxu0 %v2360_v27 }
 0x725   : > { %2774 = vmatprep.subr.mxu0 %v3044_v15 }
 0x726   : > { %2775 = vmatpush3.msra.mxu0 %v2359_v28 }
 0x727   : > { %2776 = vmatprep.subr.mxu0 %v3044_v15 }
 0x728   : > { %2777 = vmatpush3.msra.mxu0 %v2358_v29 }
 0x729   : > { %2778 = vmatprep.subr.mxu0 %v3044_v15 }
 0x72a   : > { %2779 = vmatpush3.msra.mxu0 %v2357_v30 }
 0x72b   : > { %2780 = vmatprep.subr.mxu0 %v3044_v15 }
 0x72c   : > { %2781 = vmatpush3.msra.mxu0 %v2356_v31 }
 0x72d   : > { %2782 = vmatprep.subr.mxu0 %v3044_v15 }
 0x72e   : > { %2783 = vmatpush3.msra.mxu0 %v2355_v32 }
 0x72f   : > { %2784 = vmatprep.subr.mxu0 %v3044_v15 }
 0x730   : > { %2785 = vmatpush3.msra.mxu0 %v2354_v33 }
 0x731   : > { %2786 = vmatprep.subr.mxu0 %v3044_v15 }
 0x732   : > { %2787 = vmatpush3.msra.mxu0 %v2353_v34 }
 0x733   : > { %2788 = vmatprep.subr.mxu0 %v3044_v15 }
 0x734   : > { %2789 = vmatpush3.msra.mxu0 %v2352_v35 }
 0x735   : > { %2790 = vmatprep.subr.mxu0 %v3044_v15 }
 0x736   : > { %2791 = vmatpush3.msra.mxu0 %v2351_v36 }
 0x737   : > { %2792 = vmatprep.subr.mxu0 %v3044_v15 }
 0x738   : > { %2793 = vmatpush3.msra.mxu0 %v2350_v37 }
 0x7d9   : > { %v2224_v62 = vpop.f32.mrf.mxu0 }
 0x7da   : > { %v2225_v63 = vadd.f32 %v2597_v61, %v2224_v62 }
 0x7db   : > { %v2750_v1 = vpop.f32.mrf.mxu0 }
 0x7dc   : > { %v3438_v2 = vadd.f32 %v2225_v63, %v3275_v0  ;;  %v2260_v0 = vld [vmem:[%s3592_s14 + $0x10] sm:$0xff] }
 0x7dd   : > { %2754 = vmatpush3.msra.mxu1 %v2260_v0 }
 0x7de   : > { %v2231_v3 = vsel %vm649_vm0, %v3438_v2, 0.0  ;;  %2755 = vmatprep.subr.mxu1 %v3044_v15 }
 0x7df   : > { %2232 = vadd.xlane.f32.xlu1 %v2231_v3  ;;  %2756 = vmatpush3.msra.mxu1 %v2259_v10 }
 0x7e0   : > { %2757 = vmatprep.subr.mxu1 %v3044_v15  ;;  %v2604_v15 = vld [vmem:[%s3636_s24] ss:$0 sm:$0xff] }
 0x7e1   : > { %2758 = vmatpush3.msra.mxu1 %v2258_v11 }
 0x868   : > { %v2233_v4 = vpop.xlane.xlu1 %2232 }
 0x869   : > { %v2234_v5 = vmul.f32 0.03125, %v2233_v4 }
 0x86b   : > { %v2235_v6 = vsub.f32 %v3438_v2, %v2234_v5 }
 0x86d   : > { %v2236_v7 = vmul.f32 %v2235_v6, %v2235_v6 }
 0x86f   : > { %v2237_v8 = vsel %vm649_vm0, %v2236_v7, 0.0 }
 0x870   : > { %2238 = vadd.xlane.f32.xlu0 %v2237_v8 }
 0x8f9   : > { %v2239_v12 = vpop.xlane.xlu0 %2238 }
 0x8fa   : > { %v2240_v13 = vmul.f32 0.03125, %v2239_v12 }
 0x8fc   : > { %v2241_v14 = vadd.f32 1e-05, %v2240_v13 }
 0x8fe   : > { %2894 = vrsqrt.f32 %v2241_v14 }
 0x90b   : > { %v2895_v16 = vpop.eup %2894 }
 0x90c   : > { %v2243_v18 = vmul.f32 %v2895_v16, %v2235_v6 }
 0x90e   : > { %v2250_v20 = vmul.f32 %v2599_v17, %v2243_v18 }
 0x910   : > { %v2257_v21 = vadd.f32 %v2600_v19, %v2250_v20 }
 0x912   : > { %2760 = vmatmul.mubr.msk.f32.vlgmr.msra.gmra.mxu1 %vm649_vm0, %v2257_v21 }
 0x9d2   : > { %v2338_v39 = vpop.f32.mrf.mxu1 }
 0x9d3   : > { %v2339_v40 = vadd.f32 %v2601_v38, %v2338_v39 }
 0x9d4   : > { %v2761_v41 = vpop.f32.mrf.mxu1 }
 0x9d5   : > { %v2603_v42 = vmul.f32 -1.702, %v2339_v40 }
 0x9d7   : > { %v2344_v43 = vmul.f32 1.442695, %v2603_v42 }
 0x9d9   : > { %2896 = vpow2.f32 %v2344_v43 }
 0x9e6   : > { %v2897_v44 = vpop.eup %2896 }
 0x9e7   : > { %v2346_v45 = vadd.f32 1.0, %v2897_v44 }
 0x9e9   : > { %2898 = vrcp.f32 %v2346_v45 }
 0x9f6   : > { %v2899_v46 = vpop.eup %2898 }
 0x9f7   : > { %v2349_v47 = vmul.f32 %v2899_v46, %v2339_v40 }
 0x9f9   : > { %2795 = vmatmul.mubr.f32.vlgmr.msra.gmra.mxu0 %v2349_v47 }
 0xab9   : > { %v2439_v48 = vpop.f32.mrf.mxu0 }
 0xaba   : > { %v2440_v49 = vadd.f32 %v2604_v15, %v2439_v48 }
 0xabb   : > { %v2796_v50 = vpop.f32.mrf.mxu0 }
 0xabc   : > { %v2443_v51 = vadd.f32 %v2440_v49, %v3438_v2 }
 0xabe   : > { %2444 = vst.msk [vmem:[%s644_s2] sm:$0xff] %vm649_vm0, %v2443_v51 }
 0xabf   : > { %2969 = shalt.err (!%p2966_p6)
}
 0xac0   : > { %s2970_s29 = scalar_lea.hbm %s2458_s26, 128  ;;  %s2974_s22 = scalar_lea.hbm %s3638_s15, 256 }
 0xac1   : > { %p2971_p7 = scmp.ne.s32.totalorder %s2458_s26, %s2970_s29  ;;  %p2975_p4 = scmp.lt.s32.totalorder %s2458_s26, %s3638_s15 }
 0xac2   : > { %p2976_p10 = scmp.lt.s32.totalorder %s2974_s22, %s2970_s29 }
 0xac3   : > { %p2972_p1 = pnand %p2971_p7, %p3201_p9 }
 0xac4   : > { %p2977_p8 = por %p2976_p10, %p2975_p4 }
 0xac5   : > { %p2973_p2 = pneg %p2972_p1 }
 0xac7   : > { %p2978_p0 = pnand %p2977_p8, %p2973_p2 }
 0xac9   : > { %2981 = shalt.err (!%p2978_p0)
}
 0xaca   : > { %2801 = dma.vmem_to_hbm [thread:$0]  (%p3201_p9), %s2461_s25, 128, %s2458_s26, %s2446_s20  }
 0xacb PF: > { %s3639_s3 = sld [smem:[#allocation11_spill]]  ;;  %p3641_p3 = scmp.ge.s32.totalorder %s3040_s19, 2 }
 0xacd   : > { %p2811_p13 = pnand %p3641_p3, %p3208_p11 }
 0xacf   : > { %p2812_p5 = pneg %p2811_p13 }
 0xad1   : > { %s2472_s30 = sand.u32 1, %s3639_s3  }
 0xad2   : > { %s2473_s23 = scalar_lea.sflag [#allocation4], %s2472_s30 }
 0xad3   : > { %3015 = dma.done.wait (%p2812_p5), %s2473_s23, 128  }
 0xad4   : > { %3017 = vsyncadd (%p2812_p5), %s2473_s23, 4294967168  ;;  %s37_s19 = sadd.s32 1, %s3040_s19   ;;  %s3642_s1 = sld [smem:[#allocation12_spill]] }
 0xad5   : > { %p34_p12 = scmp.ge.s32.totalorder %s37_s19, 4   ;;  %s3643_s29 = sld [smem:[#allocation17_spill]] }
 0xad6   : > { %s3644_s30 = sld [smem:[#allocation14_spill]]  ;;  %s3646_s27 = smov %s3024_s28 }
 0xad7   : > { %s3645_s0 = sld [smem:[#allocation15_spill]]  ;;  %36 = sbr.rel (!%p34_p12) target bundleno = 17 (0x11), region = 150 }
 0xada   : > { %s3647_s28 = smov %s3642_s1 }
 0xadc   :  { %2478 = vsyncpa [#allocation3], 1 }
 0xadd   :  { %2480 = vsyncpa [#allocation3 + $0x1], 1 }
 0xade   :  { %2481 = vsyncpa [#allocation6], 1 }
 0xadf   :  { %2483 = vsyncpa [#allocation6 + $0x1], 1 }
 0xae0   :  { %2484 = vsyncpa [#allocation4], 1 }
 0xae1   :  { %2486 = vsyncpa [#allocation4 + $0x1], 1 }

</bundles_post_ra>
